<compile_context>
chip_gen: v5e
topology: v5e:2x2
jax: 0.10.0
libtpu: 0.0.40
codegen_flags: <defaults>
</compile_context>

<pallas_src>
import functools

import jax
import jax.numpy as jnp
from jax import lax
from jax.experimental import pallas as pl
from jax.experimental.pallas import tpu as pltpu


def _round_up(x: int, m: int) -> int:
    return ((x + m - 1) // m) * m


def _pick_tile(dim: int, max_tile: int, multiple: int = 128) -> int:
    """Largest multiple of `multiple` <= max_tile that evenly divides `dim`.
    `dim` is already a multiple of `multiple`."""
    if dim <= max_tile:
        return dim
    t = max_tile - (max_tile % multiple)
    while t >= multiple:
        if dim % t == 0:
            return t
        t -= multiple
    return multiple


def _tpu_vmem_capacity_bytes() -> int:
    """Per-generation VMEM capacity; conservative 64 MiB (v7x) fallback."""
    try:
        return int(pltpu.get_tpu_info().vmem_capacity_bytes)
    except Exception:
        try:
            kind = jax.devices()[0].device_kind.lower()
            if "v5" in kind or "v6" in kind:
                return 128 * 1024 * 1024
        except Exception:
            pass
        return 64 * 1024 * 1024


def _mlp_kernel(x_ref, w_ref, b_ref, o_ref, acc_ref, *, out_layer: bool):
    # x_ref: (tm, tk)   w_ref: (tk, tn)  [pre-transposed (K, N) layout]
    # b_ref: (1, tn) f32   o_ref: (tm, tn)   acc_ref: (tm, tn) f32
    k = pl.program_id(2)

    @pl.when(k == 0)
    def _():
        acc_ref[...] = jnp.zeros_like(acc_ref)

    # Plain (M,K) x (K,N) contraction -> straight MXU matmul, no transposes.
    acc_ref[...] += jnp.dot(x_ref[...], w_ref[...],
                            preferred_element_type=jnp.float32)

    @pl.when(k == pl.num_programs(2) - 1)
    def _():
        y = acc_ref[...] + b_ref[...]          # f32 epilogue, bias broadcast
        if out_layer:
            act = jax.nn.sigmoid(y)
        else:
            act = jnp.maximum(y, 0.0)
        o_ref[...] = act.astype(o_ref.dtype)


def prepare_mlp_params(weight, bias, *, compute_dtype=None):
    """Pad (zero-fill!) and transpose the PyTorch-layout (N, K) weight ONCE.

    Returns (w_kn, b_pad, n_out):
      w_kn  : (Kp, Np) weight, K/N padded to 128-multiples, zero-filled so the
              padded contraction columns contribute exactly zero.
      b_pad : (1, Np) f32 bias.
      n_out : original N (for slicing the kernel output).
    Cache the result and reuse it across forward calls -> no per-call HBM
    re-pad / re-transpose of the weight.
    """
    N, K = weight.shape
    Kp = _round_up(K, 128)
    Np = _round_up(N, 128)
    w = weight if compute_dtype is None else weight.astype(compute_dtype)
    wp = jnp.pad(w, ((0, Np - N), (0, Kp - K)))   # zero-filled K padding
    w_kn = jnp.asarray(wp.T)                      # materialize (Kp, Np) once
    b_pad = jnp.pad(bias.astype(jnp.float32), (0, Np - N)).reshape(1, Np)
    return w_kn, b_pad, N


def mlp_forward(x, w_kn, b_pad, n_out, *, out_layer: bool = False,
                tm_max: int | None = None, tn_max: int | None = None,
                tk_max: int | None = None):
    """x: (..., K); w_kn: prepared (Kp, Np) weight; b_pad: (1, Np) f32 bias.
    Returns activation( x @ W.T + b ) with shape (..., n_out)."""
    orig_shape = x.shape
    K = orig_shape[-1]
    Kp, Np = w_kn.shape
    assert Kp >= K and Kp % 128 == 0 and Np % 128 == 0

    if x.dtype != w_kn.dtype:                    # e.g. bf16 weight path
        x = x.astype(w_kn.dtype)
    x2 = x.reshape(-1, K)
    M = x2.shape[0]

    itemsize = jnp.dtype(x2.dtype).itemsize
    w_itemsize = jnp.dtype(w_kn.dtype).itemsize

    vmem_cap = _tpu_vmem_capacity_bytes()
    big_vmem = vmem_cap >= 100 * 1024 * 1024     # v5e / v6e
    if tm_max is None:
        tm_max = 512
    if tn_max is None:
        tn_max = 1024 if big_vmem else 512
    if tk_max is None:
        tk_max = 2048 if big_vmem else 1024

    # ---- M: pad only to the sublane multiple; tm == Mp for small batches ----
    sub = max(8, 32 // itemsize)                 # 8 for f32, 16 for bf16
    tm_max = _round_up(tm_max, sub)
    Mp = _round_up(M, sub)
    tm = min(tm_max, Mp)
    if Mp > tm:
        Mp = _round_up(Mp, tm)

    # ---- N / K: tiles are 128-multiples that evenly divide the padded dims ----
    tn = _pick_tile(Np, tn_max)
    tk = _pick_tile(Kp, tk_max)

    # Only the activation gets a per-call pad (weight/bias were padded once).
    xp = jnp.pad(x2, ((0, Mp - M), (0, Kp - K))) if (Mp != M or Kp != K) else x2

    grid = (Mp // tm, Np // tn, Kp // tk)

    # Live VMEM: double-buffered x / w / bias / out tiles + f32 accumulator.
    vmem_need = (2 * tm * tk * itemsize
                 + 2 * tk * tn * w_itemsize
                 + 2 * tn * 4
                 + 2 * tm * tn * itemsize
                 + tm * tn * 4)
    vmem_limit = int(min(vmem_cap - 16 * 1024 * 1024,
                         max(vmem_need + (4 << 20), 32 * 1024 * 1024)))
    vmem_limit = max(vmem_limit, vmem_need + (1 << 20))

    cost = pl.CostEstimate(
        flops=2 * Mp * Np * Kp,
        transcendentals=Mp * Np if out_layer else 0,
        bytes_accessed=int((Np // tn) * Mp * Kp * itemsize      # x re-streamed per N tile
                           + (Mp // tm) * Kp * Np * w_itemsize  # W re-streamed per M tile
                           + Mp * Np * itemsize + Np * 4),
    )

    kernel = functools.partial(_mlp_kernel, out_layer=out_layer)

    out_p = pl.pallas_call(
        kernel,
        out_shape=jax.ShapeDtypeStruct((Mp, Np), x2.dtype),
        grid_spec=pltpu.PrefetchScalarGridSpec(
            num_scalar_prefetch=0,
            grid=grid,
            in_specs=[
                pl.BlockSpec((tm, tk), lambda i, j, k: (i, k)),   # x tile
                pl.BlockSpec((tk, tn), lambda i, j, k: (k, j)),   # weight tile (K,N)
                pl.BlockSpec((1, tn), lambda i, j, k: (0, j)),    # bias tile
            ],
            out_specs=pl.BlockSpec((tm, tn), lambda i, j, k: (i, j)),
            scratch_shapes=[pltpu.VMEM((tm, tn), jnp.float32)],
        ),
        compiler_params=pltpu.CompilerParams(
            dimension_semantics=("parallel", "parallel", "arbitrary"),
            vmem_limit_bytes=vmem_limit,
        ),
        cost_estimate=cost,
    )(xp, w_kn, b_pad)

    out = out_p[:M, :n_out]
    return out.reshape(orig_shape[:-1] + (n_out,))


def _init_linear_params(key, in_channels, out_channels, dtype=jnp.float32):
    # Deterministic init mirroring torch.nn.Linear shapes: W (out, in), b (out,)
    kw, kb = jax.random.split(key)
    bound = 1.0 / jnp.sqrt(in_channels)
    w = jax.random.uniform(kw, (out_channels, in_channels), dtype, -bound, bound)
    b = jax.random.uniform(kb, (out_channels,), dtype, -bound, bound)
    return w, b


if __name__ == "__main__":
    key = jax.random.PRNGKey(0)
    k_x, k_p, k_x2, k_p2 = jax.random.split(key, 4)

    # ---- MLP(in_channels=32, out_channels=64), batch=8 (small, f32) ----
    batch, in_channels, out_channels = 8, 32, 64
    x = jax.random.normal(k_x, (batch, in_channels), jnp.float32)
    weight, bias = _init_linear_params(k_p, in_channels, out_channels)

    # Pad + transpose parameters ONCE (cached across calls).
    w_kn, b_pad, n_out = prepare_mlp_params(weight, bias)

    y_relu = mlp_forward(x, w_kn, b_pad, n_out, out_layer=False)   # hidden layer
    y_sig = mlp_forward(x, w_kn, b_pad, n_out, out_layer=True)     # output layer
    jax.block_until_ready((y_relu, y_sig))

    ref = x @ weight.T + bias
    assert y_relu.shape == (batch, out_channels)
    assert y_sig.shape == (batch, out_channels)
    assert jnp.allclose(y_relu, jnp.maximum(ref, 0.0), atol=1e-5)
    assert jnp.allclose(y_sig, jax.nn.sigmoid(ref), atol=1e-5)

    # ---- non-128-multiple features to exercise padding/tiling logic ----
    batch2, in2, out2 = 10, 300, 200
    x_b = jax.random.normal(k_x2, (batch2, in2), jnp.float32)
    w_b, b_b = _init_linear_params(k_p2, in2, out2)
    w_b_kn, b_b_pad, n_b = prepare_mlp_params(w_b, b_b)
    y2 = mlp_forward(x_b, w_b_kn, b_b_pad, n_b, out_layer=False)
    jax.block_until_ready(y2)
    ref2 = jnp.maximum(
        jnp.dot(x_b, w_b.T, precision=lax.Precision.HIGHEST) + b_b, 0.0)
    assert y2.shape == (batch2, out2)
    assert jnp.allclose(y2, ref2, atol=1e-3, rtol=1e-3)

    # ---- optional bf16 compute path (f32 MXU accumulation, f32 epilogue) ----
    w_kn16, b_pad16, n16 = prepare_mlp_params(weight, bias,
                                              compute_dtype=jnp.bfloat16)
    y_bf16 = mlp_forward(x, w_kn16, b_pad16, n16, out_layer=False)
    jax.block_until_ready(y_bf16)
    assert y_bf16.shape == (batch, out_channels)
    assert jnp.allclose(y_bf16.astype(jnp.float32),
                        jnp.maximum(ref, 0.0), atol=5e-2)

    print("KERNEL_OK")
</pallas_src>

<mosaic_0001>
module attributes {stable_mosaic.version = 11 : i64} {
  func.func @_mlp_kernel(%arg0: i32, %arg1: i32, %arg2: i32, %arg3: memref<8x128xf32, #tpu.memory_space<vmem>>, %arg4: memref<128x128xf32, #tpu.memory_space<vmem>>, %arg5: memref<1x128xf32, #tpu.memory_space<vmem>>, %arg6: memref<8x128xf32, #tpu.memory_space<vmem>>, %arg7: memref<8x128xf32, #tpu.memory_space<vmem>>) attributes {dimension_semantics = [#tpu.dimension_semantics<parallel>, #tpu.dimension_semantics<parallel>, #tpu.dimension_semantics<arbitrary>], iteration_bounds = array<i64: 1, 1, 1>, scalar_prefetch = 0 : i64, scratch_operands = 1 : i64, tpu.core_type = #tpu.core_type<tc>, window_params = [{transform_indices = @transform_0, window_bounds = array<i64: 8, 128>}, {transform_indices = @transform_1, window_bounds = array<i64: 128, 128>}, {transform_indices = @transform_2, window_bounds = array<i64: 1, 128>}, {transform_indices = @transform_3, window_bounds = array<i64: 8, 128>}]} {
    %c0_i32 = arith.constant 0 : i32
    %0 = arith.cmpi eq, %arg2, %c0_i32 : i32
    %1 = arith.extui %0 : i1 to i32
    %c0_i32_0 = arith.constant 0 : i32
    %2 = arith.cmpi ne, %1, %c0_i32_0 : i32
    scf.if %2 {
      %cst_10 = arith.constant 0.000000e+00 : f32
      %12 = vector.broadcast %cst_10 : f32 to vector<8x128xf32>
      %c0_11 = arith.constant 0 : index
      %c0_12 = arith.constant 0 : index
      %13 = vector.load %arg7[%c0_11, %c0_12] : memref<8x128xf32, #tpu.memory_space<vmem>>, vector<8x128xf32>
      tpu.vector_store %arg7[%c0_11, %c0_12], %12 {strides = array<i32>} : memref<8x128xf32, #tpu.memory_space<vmem>>, vector<8x128xf32>,
    } else {
    }
    %c0 = arith.constant 0 : index
    %c0_1 = arith.constant 0 : index
    %3 = vector.load %arg7[%c0, %c0_1] : memref<8x128xf32, #tpu.memory_space<vmem>>, vector<8x128xf32>
    %c0_2 = arith.constant 0 : index
    %c0_3 = arith.constant 0 : index
    %4 = vector.load %arg3[%c0_2, %c0_3] : memref<8x128xf32, #tpu.memory_space<vmem>>, vector<8x128xf32>
    %c0_4 = arith.constant 0 : index
    %c0_5 = arith.constant 0 : index
    %5 = vector.load %arg4[%c0_4, %c0_5] : memref<128x128xf32, #tpu.memory_space<vmem>>, vector<128x128xf32>
    %cst = arith.constant dense<0.000000e+00> : vector<8x128xf32>
    %6 = tpu.matmul %4, %5, %cst {dimension_numbers = #tpu.dot_dimension_numbers<[1], [0], [0], [1], [0, 0, 1, 1], [], []>} : vector<8x128xf32>, vector<128x128xf32>, vector<8x128xf32> -> vector<8x128xf32>
    %7 = arith.addf %3, %6 : vector<8x128xf32>
    %c0_6 = arith.constant 0 : index
    %c0_7 = arith.constant 0 : index
    %8 = vector.load %arg7[%c0_6, %c0_7] : memref<8x128xf32, #tpu.memory_space<vmem>>, vector<8x128xf32>
    tpu.vector_store %arg7[%c0_6, %c0_7], %7 {strides = array<i32>} : memref<8x128xf32, #tpu.memory_space<vmem>>, vector<8x128xf32>,
    %c0_i32_8 = arith.constant 0 : i32
    %9 = arith.cmpi eq, %arg2, %c0_i32_8 : i32
    %10 = arith.extui %9 : i1 to i32
    %c0_i32_9 = arith.constant 0 : i32
    %11 = arith.cmpi ne, %10, %c0_i32_9 : i32
    scf.if %11 {
      %c0_10 = arith.constant 0 : index
      %c0_11 = arith.constant 0 : index
      %12 = vector.load %arg7[%c0_10, %c0_11] : memref<8x128xf32, #tpu.memory_space<vmem>>, vector<8x128xf32>
      %c0_12 = arith.constant 0 : index
      %c0_13 = arith.constant 0 : index
      %13 = vector.load %arg5[%c0_12, %c0_13] : memref<1x128xf32, #tpu.memory_space<vmem>>, vector<1x128xf32>
      %14 = vector.broadcast %13 : vector<1x128xf32> to vector<8x128xf32>
      %15 = arith.addf %12, %14 : vector<8x128xf32>
      %cst_14 = arith.constant 0.000000e+00 : f32
      %16 = vector.broadcast %cst_14 : f32 to vector<8x128xf32>
      %17 = arith.maximumf %15, %16 : vector<8x128xf32>
      %c0_15 = arith.constant 0 : index
      %c0_16 = arith.constant 0 : index
      %18 = vector.load %arg6[%c0_15, %c0_16] : memref<8x128xf32, #tpu.memory_space<vmem>>, vector<8x128xf32>
      tpu.vector_store %arg6[%c0_15, %c0_16], %17 {strides = array<i32>} : memref<8x128xf32, #tpu.memory_space<vmem>>, vector<8x128xf32>,
    } else {
    }
    return
  }
  func.func @transform_0(%arg0: i32, %arg1: i32, %arg2: i32) -> (i32, i32) {
    %c0_i32 = arith.constant 0 : i32
    return %arg0, %arg2 : i32, i32
  }
  func.func @transform_1(%arg0: i32, %arg1: i32, %arg2: i32) -> (i32, i32) {
    %c0_i32 = arith.constant 0 : i32
    return %arg2, %arg1 : i32, i32
  }
  func.func @transform_2(%arg0: i32, %arg1: i32, %arg2: i32) -> (i32, i32) {
    %c0_i32 = arith.constant 0 : i32
    %c0_i32_0 = arith.constant 0 : i32
    return %c0_i32, %arg1 : i32, i32
  }
  func.func @transform_3(%arg0: i32, %arg1: i32, %arg2: i32) -> (i32, i32) {
    %c0_i32 = arith.constant 0 : i32
    return %arg0, %arg1 : i32, i32
  }
}

</mosaic_0001>

<bundles_post_ra>
// kernel: tpu_custom_call.1
= control target key start
LH: loop header
LB: loop body
LE: loop exit
PB: predicated region body
PF: predicated region fallthrough
CT: control target
= control target key end

     0   :  { %8 = vsyncpa [#allocation4], 0  ;;  %s240_s0 = inlined_call_operand.hbm [shape: f32[8,128], index: 0, kind: input, shape index: {}]   ;;  %s241_s1 = inlined_call_operand.hbm [shape: f32[128,128], index: 1, kind: input, shape index: {}]   ;;  %s242_s2 = inlined_call_operand.vmem [shape: f32[1,128], index: 2, kind: input, shape index: {}]   ;;  %s243_s3 = inlined_call_operand.hbm [shape: f32[8,128], index: 3, kind: output, shape index: {}]  }
   0x1   :  { %9 = vsyncpa [#allocation7], 0 }
   0x2   :  { %10 = vsyncpa [#allocation5], 0  ;;  %s16_s14 = sshll.u32 %s240_s0, 4  ;;  %s203_s15 = smov [#allocation3]   ;;  %s17_s14 = int_to_ptr.hbm [resolvable:$true] %s16_s14 }
   0x3   :  { %s18_s16 = sshll.u32 %s203_s15, 4  ;;  %s26_s19 = sshll.u32 %s241_s1, 4  ;;  %s19_s16 = int_to_ptr.vmem [resolvable:$true] %s18_s16  ;;  %s27_s19 = int_to_ptr.hbm [resolvable:$true] %s26_s19 }
   0x4   :  { %21 = dma.hbm_to_vmem [thread:$0]  %s17_s14, 128, %s19_s16, [#allocation4]  }
   0x5   :  { %s204_s20 = smov [#allocation6]   ;;  %s205_s22 = smov 128  }
   0x6   :  { %s28_s21 = sshll.u32 %s204_s20, 4  ;;  %s206_s23 = smov 8   ;;  %s29_s21 = int_to_ptr.vmem [resolvable:$true] %s28_s21 }
   0x7   :  { %34 = dma.hbm_to_vmem [thread:$0]  %s27_s19, 2048, %s29_s21, [#allocation7], %s205_s22, %s205_s22, %s206_s23  }
   0x8   :  { %197 = dma.done.wait [#allocation4], 128  }
   0x9   :  { %198 = vsyncadd [#allocation4], 4294967168 }
   0xa   :  { %199 = dma.done.wait [#allocation7], 2048  }
   0xb   :  { %200 = vsyncadd [#allocation7], 4294965248  ;;  %v67_v0 = vld [vmem:[#allocation6 + $0x78] sm:$0xff]  ;;  %v66_v1 = vld [vmem:[#allocation6 + $0x70] sm:$0xff]  ;;  %s207_s24 = smov [#allocation8]   ;;  %s108_s28 = sshll.u32 %s243_s3, 4  ;;  %s109_s28 = int_to_ptr.hbm [resolvable:$true] %s108_s28 }
   0xc   :  { %68 = vmatpush.msra.mxu0 %v67_v0  ;;  %v65_v2 = vld [vmem:[#allocation6 + $0x68] sm:$0xff]  ;;  %v64_v3 = vld [vmem:[#allocation6 + $0x60] sm:$0xff]  ;;  %v63_v4 = vld [vmem:[#allocation6 + $0x58] sm:$0xff]  ;;  %s106_s25 = sshll.u32 %s207_s24, 4  ;;  %s107_s25 = int_to_ptr.vmem [resolvable:$true] %s106_s25 }
   0xd   :  { %v62_v5 = vld [vmem:[#allocation6 + $0x50] sm:$0xff]  ;;  %v61_v6 = vld [vmem:[#allocation6 + $0x48] sm:$0xff]  ;;  %v60_v7 = vld [vmem:[#allocation6 + $0x40] sm:$0xff] }
   0xe   :  { %69 = vmatpush.msra.mxu0 %v66_v1  ;;  %v59_v8 = vld [vmem:[#allocation6 + $0x38] sm:$0xff]  ;;  %v58_v9 = vld [vmem:[#allocation6 + $0x30] sm:$0xff]  ;;  %v57_v10 = vld [vmem:[#allocation6 + $0x28] sm:$0xff] }
   0xf   :  { %v56_v11 = vld [vmem:[#allocation6 + $0x20] sm:$0xff]  ;;  %v55_v12 = vld [vmem:[#allocation6 + $0x18] sm:$0xff]  ;;  %v54_v13 = vld [vmem:[#allocation6 + $0x10] sm:$0xff] }
  0x10   :  { %70 = vmatpush.msra.mxu0 %v65_v2  ;;  %v53_v14 = vld [vmem:[#allocation6 + $0x8] sm:$0xff]  ;;  %v52_v15 = vld [vmem:[#allocation6] sm:$0xff]  ;;  %v51_v16 = vld [vmem:[#allocation3] sm:$0xff] }
  0x11   :  { %v124_v17 = vld [vmem:[%s242_s2] ss:$0 sm:$0xff] }
  0x12   :  { %71 = vmatpush.msra.mxu0 %v64_v3 }
  0x14   :  { %72 = vmatpush.msra.mxu0 %v63_v4 }
  0x16   :  { %73 = vmatpush.msra.mxu0 %v62_v5 }
  0x18   :  { %74 = vmatpush.msra.mxu0 %v61_v6 }
  0x1a   :  { %75 = vmatpush.msra.mxu0 %v60_v7 }
  0x1c   :  { %76 = vmatpush.msra.mxu0 %v59_v8 }
  0x1e   :  { %77 = vmatpush.msra.mxu0 %v58_v9 }
  0x20   :  { %78 = vmatpush.msra.mxu0 %v57_v10 }
  0x22   :  { %79 = vmatpush.msra.mxu0 %v56_v11 }
  0x24   :  { %80 = vmatpush.msra.mxu0 %v55_v12 }
  0x26   :  { %81 = vmatpush.msra.mxu0 %v54_v13 }
  0x28   :  { %82 = vmatpush.msra.mxu0 %v53_v14 }
  0x2a   :  { %83 = vmatpush.msra.mxu0 %v52_v15 }
  0x2b   :  { %84 = vmatmul.f32.vlgmr.msra.gmra.mxu0 %v51_v16 }
  0xa8   :  { %v85_v18 = vpop.f32.mrf.mxu0 }
  0xa9   :  { %v98_v19 = vadd.f32 %v124_v17, %v85_v18 }
  0xab   :  { %v99_v20 = vmax.f32 %v98_v19, 0.0 }
  0xad   :  { %100 = vst [vmem:[#allocation8] sm:$0xff] %v99_v20 }
  0xae   :  { %111 = dma.vmem_to_hbm [thread:$0]  %s107_s25, 128, %s109_s28, [#allocation5]  }
  0xaf   :  { %201 = dma.done.wait [#allocation5], 128  }
  0xb0   :  { %202 = vsyncadd [#allocation5], 4294967168 }
  0xb1   :  { %116 = vsyncpa [#allocation4], 1 }
  0xb2   :  { %117 = vsyncpa [#allocation7], 1 }
  0xb3   :  { %118 = vsyncpa [#allocation5], 1 }

</bundles_post_ra>
